<compile_context>
chip_gen: v5e
topology: v5e:2x2
jax: 0.10.0
libtpu: 0.0.40
codegen_flags: <defaults>
</compile_context>

<pallas_src>
import jax
import jax.numpy as jnp
import numpy as np
from jax.experimental import pallas as pl
from jax.experimental.pallas import tpu as pltpu

hidden_dim = 32
input_dim = 1
num_layers = 2
output_dim = 1


def lstm_kernel(x_ref, wih0c_ref, bcomb_ref, wblk_ref, wfc_ref, bfc_ref, out_ref):
    """Fused 2-layer LSTM recurrence + final Linear.  All refs live in VMEM.

    Wave scheme: persistent combined state h=[h0|h1], c=[c0|c1] (B,2H),
    staggered one step between the layers.  Wave t consumes [h0_t | h1_{t-1}]
    and one MXU push produces layer-0 gates for step t+1 AND layer-1 gates for
    step t simultaneously.

    x_ref:     (T, B, 1)   time-major input (B padded to a sublane group)
    wih0c_ref: (1, 8H)     layer-0 input->gate row scattered into combined
                           lanes (layer-1 lanes are zero)
    bcomb_ref: (1, 8H)     combined biases (b_ih + b_hh, both layers)
    wblk_ref:  (2H, 8H)    block weight [[Whh0^T, Wih1^T],[0, Whh1^T]],
                           columns permuted to (i0,i1,f0,f1,g0,g1,o0,o1), bf16
    wfc_ref:   (1, H), bfc_ref: (1, O)
    out_ref:   (B, O)
    """
    T, B, _ = x_ref.shape
    H2, G = wblk_ref.shape                  # 2H, 8H
    H = H2 // 2

    wih0c = wih0c_ref[...]                  # (1, 8H)  f32
    bcomb = bcomb_ref[...]                  # (1, 8H)  f32
    w_blk = wblk_ref[...]                   # (2H, 8H) bf16 MXU operand

    # Hoisted, time-invariant layer-0 input projection (+ both biases): one
    # vectorized VPU op before the loop, kept as a traced value (vregs), no
    # VMEM scratch round trip.
    off = x_ref[...] * wih0c.reshape(1, 1, G) + bcomb.reshape(1, 1, G)  # (T,B,8H)

    def nonlin(gates):
        # Two full-width EUP pushes over the combined (B, 8H) gates.
        sg = jax.nn.sigmoid(gates)
        th = jnp.tanh(gates)
        return (sg[:, 0:H2], sg[:, H2:2 * H2],
                th[:, 2 * H2:3 * H2], sg[:, 3 * H2:4 * H2])

    # ---- init (no matmul: all initial states are zero) ----------------------
    # off[0]'s layer-0 lanes are exactly gates0 at t=0; the layer-1 lanes are
    # junk and get masked out of the combined state (h1_{-1} = c1_{-1} = 0).
    lane = jax.lax.broadcasted_iota(jnp.int32, (B, H2), 1)
    mask0 = (lane < H).astype(jnp.float32)          # [1..1 | 0..0]
    i_g, f_g, g_g, o_g = nonlin(off[0])
    c = (i_g * g_g) * mask0                         # c = [c0_0 | 0]
    h = o_g * jnp.tanh(c)                           # h = [h0_0 | 0]

    # ---- waves: ONE MXU push per recurrence step ----------------------------
    # Wave t: [h0_t | h1_{t-1}] -> gates -> [h0_{t+1} | h1_t].
    # T is small & static: full trace-time unroll for LLO wavefront visibility.
    for t in range(T):
        # Last wave's layer-0 half is unused -> only the biases are needed.
        off_next = off[t + 1] if t + 1 < T else bcomb
        gates = jnp.dot(h.astype(jnp.bfloat16), w_blk,
                        preferred_element_type=jnp.float32) + off_next
        i_g, f_g, g_g, o_g = nonlin(gates)
        c = f_g * c + i_g * g_g
        h = o_g * jnp.tanh(c)

    # ---- final Linear (H -> 1): VPU multiply + lane reduction ---------------
    h1 = h[:, H:]                                   # layer-1 hidden at final step
    out_ref[...] = (jnp.sum(h1 * wfc_ref[...], axis=-1, keepdims=True)
                    + bfc_ref[...])


def prepare_params(params):
    """One-time weight prep: block weight, combined-lane input row & biases."""
    H, O = hidden_dim, output_dim
    G4, G8 = 4 * H, 8 * H

    # Column permutation: (i0,f0,g0,o0 | i1,f1,g1,o1) -> (i0,i1,f0,f1,g0,g1,o0,o1)
    col_perm = np.concatenate(
        [np.arange(g * H, (g + 1) * H) + l * G4 for g in range(4) for l in range(2)])

    # Block weight [[Whh0^T, Wih1^T], [0, Whh1^T]] -> (2H, 8H), permuted, bf16.
    top = jnp.concatenate([params["whh0"].T, params["wih1"].T], axis=1)      # (H, 8H)
    bot = jnp.concatenate([jnp.zeros((H, G4), jnp.float32), params["whh1"].T],
                          axis=1)                                            # (H, 8H)
    w_blk = jnp.concatenate([top, bot], axis=0)[:, col_perm].astype(jnp.bfloat16)

    # Layer-0 input row scattered into combined lanes (layer-1 lanes zero).
    wih0c = jnp.concatenate([params["wih0"].T.reshape(1, G4),
                             jnp.zeros((1, G4), jnp.float32)], axis=1)[:, col_perm]

    # Combined pre-summed biases for both layers, permuted.
    bcomb = jnp.concatenate([params["bih0"] + params["bhh0"],
                             params["bih1"] + params["bhh1"]]).reshape(1, G8)[:, col_perm]

    return {
        "wih0c": wih0c.astype(jnp.float32),
        "bcomb": bcomb.astype(jnp.float32),
        "w_blk": w_blk,
        "wfc_row": params["wfc"].reshape(1, H).astype(jnp.float32),
        "bfc": params["bfc"].reshape(1, O).astype(jnp.float32),
    }


@jax.jit
def lstm_forward(x, prep):
    B, T, _ = x.shape
    O = output_dim
    Bp = ((B + 7) // 8) * 8                     # pad batch to a full sublane group
    x_p = jnp.pad(x.astype(jnp.float32), ((0, Bp - B), (0, 0), (0, 0)))
    x_tm = jnp.transpose(x_p, (1, 0, 2))        # (T, Bp, 1) time-major

    args = (x_tm, prep["wih0c"], prep["bcomb"], prep["w_blk"],
            prep["wfc_row"], prep["bfc"])

    out = pl.pallas_call(
        lstm_kernel,
        out_shape=jax.ShapeDtypeStruct((Bp, O), jnp.float32),
        in_specs=[pl.BlockSpec(memory_space=pltpu.MemorySpace.VMEM)] * len(args),
        out_specs=pl.BlockSpec(memory_space=pltpu.MemorySpace.VMEM),
    )(*args)
    return out[:B]


def lstm_ref(x, params):
    """Pure-JAX reference matching torch.nn.LSTM semantics."""
    B, T, _ = x.shape
    H = hidden_dim
    wih = [params["wih0"], params["wih1"]]
    whh = [params["whh0"], params["whh1"]]
    bih = [params["bih0"], params["bih1"]]
    bhh = [params["bhh0"], params["bhh1"]]
    h = [jnp.zeros((B, H)), jnp.zeros((B, H))]
    c = [jnp.zeros((B, H)), jnp.zeros((B, H))]
    for t in range(T):
        inp = x[:, t, :]
        for l in range(num_layers):
            g = inp @ wih[l].T + bih[l] + h[l] @ whh[l].T + bhh[l]
            i_g = jax.nn.sigmoid(g[:, :H])
            f_g = jax.nn.sigmoid(g[:, H:2 * H])
            g_g = jnp.tanh(g[:, 2 * H:3 * H])
            o_g = jax.nn.sigmoid(g[:, 3 * H:])
            c[l] = f_g * c[l] + i_g * g_g
            h[l] = o_g * jnp.tanh(c[l])
            inp = h[l]
    return h[-1] @ params["wfc"].T + params["bfc"]


def init_params(key):
    """Deterministic init; same shapes as nn.LSTM/nn.Linear (U(-k, k), k=1/sqrt(H))."""
    H, I, O = hidden_dim, input_dim, output_dim
    k = 1.0 / np.sqrt(H)
    shapes = {
        "wih0": (4 * H, I), "whh0": (4 * H, H), "bih0": (4 * H,), "bhh0": (4 * H,),
        "wih1": (4 * H, H), "whh1": (4 * H, H), "bih1": (4 * H,), "bhh1": (4 * H,),
        "wfc": (O, H), "bfc": (O,),
    }
    params = {}
    keys = jax.random.split(key, len(shapes))
    for sub, (name, shape) in zip(keys, shapes.items()):
        params[name] = jax.random.uniform(sub, shape, jnp.float32, -k, k)
    return params


if __name__ == "__main__":
    root = jax.random.PRNGKey(0)
    k_param, k_x = jax.random.split(root)

    params = init_params(k_param)
    prep = prepare_params(params)

    batch, seq = 2, 8
    x = jax.random.normal(k_x, (batch, seq, input_dim), jnp.float32)

    out = lstm_forward(x, prep)
    out = jax.block_until_ready(out)

    ref = lstm_ref(x, params)
    assert out.shape == (batch, output_dim)
    np.testing.assert_allclose(np.asarray(out), np.asarray(ref), atol=1e-2, rtol=1e-2)

    print("KERNEL_OK")
</pallas_src>

<mosaic_0001>
module attributes {stable_mosaic.version = 11 : i64} {
  func.func @lstm_kernel(%arg0: memref<8x8x1xf32, #tpu.memory_space<vmem>>, %arg1: memref<1x256xf32, #tpu.memory_space<vmem>>, %arg2: memref<1x256xf32, #tpu.memory_space<vmem>>, %arg3: memref<64x256xbf16, #tpu.memory_space<vmem>>, %arg4: memref<1x32xf32, #tpu.memory_space<vmem>>, %arg5: memref<1x1xf32, #tpu.memory_space<vmem>>, %arg6: memref<8x1xf32, #tpu.memory_space<vmem>>) attributes {dimension_semantics = [], scalar_prefetch = 0 : i64, scratch_operands = 0 : i64, tpu.core_type = #tpu.core_type<tc>} {
    %c0 = arith.constant 0 : index
    %c0_0 = arith.constant 0 : index
    %0 = vector.load %arg1[%c0, %c0_0] : memref<1x256xf32, #tpu.memory_space<vmem>>, vector<1x256xf32>
    %c0_1 = arith.constant 0 : index
    %c0_2 = arith.constant 0 : index
    %1 = vector.load %arg2[%c0_1, %c0_2] : memref<1x256xf32, #tpu.memory_space<vmem>>, vector<1x256xf32>
    %c0_3 = arith.constant 0 : index
    %c0_4 = arith.constant 0 : index
    %2 = vector.load %arg3[%c0_3, %c0_4] : memref<64x256xbf16, #tpu.memory_space<vmem>>, vector<64x256xbf16>
    %c0_5 = arith.constant 0 : index
    %c0_6 = arith.constant 0 : index
    %c0_7 = arith.constant 0 : index
    %3 = vector.load %arg0[%c0_5, %c0_6, %c0_7] : memref<8x8x1xf32, #tpu.memory_space<vmem>>, vector<8x8x1xf32>
    %4 = vector.shape_cast %0 : vector<1x256xf32> to vector<1x1x256xf32>
    %5 = vector.broadcast %3 : vector<8x8x1xf32> to vector<8x8x256xf32>
    %6 = vector.broadcast %4 : vector<1x1x256xf32> to vector<8x8x256xf32>
    %7 = arith.mulf %5, %6 : vector<8x8x256xf32>
    %8 = vector.shape_cast %1 : vector<1x256xf32> to vector<1x1x256xf32>
    %9 = vector.broadcast %8 : vector<1x1x256xf32> to vector<8x8x256xf32>
    %10 = arith.addf %7, %9 : vector<8x8x256xf32>
    %11 = tpu.iota {dimensions = array<i32: 1>} : vector<8x64xi32>
    %c32_i32 = arith.constant 32 : i32
    %12 = vector.broadcast %c32_i32 : i32 to vector<8x64xi32>
    %13 = arith.cmpi slt, %11, %12 : vector<8x64xi32>
    %14 = arith.extui %13 : vector<8x64xi1> to vector<8x64xi32>
    %15 = arith.sitofp %14 : vector<8x64xi32> to vector<8x64xf32>
    %16 = vector.extract_strided_slice %10 {offsets = [0, 0, 0], sizes = [1, 8, 256], strides = [1, 1, 1]} : vector<8x8x256xf32> to vector<1x8x256xf32>
    %17 = vector.shape_cast %16 : vector<1x8x256xf32> to vector<8x256xf32>
    %18 = arith.negf %17 : vector<8x256xf32>
    %19 = math.exp %18 : vector<8x256xf32>
    %cst = arith.constant 1.000000e+00 : f32
    %20 = vector.broadcast %cst : f32 to vector<8x256xf32>
    %21 = arith.addf %20, %19 : vector<8x256xf32>
    %22 = arith.divf %20, %21 : vector<8x256xf32>
    %23 = math.tanh %17 : vector<8x256xf32>
    %24 = vector.extract_strided_slice %22 {offsets = [0, 0], sizes = [8, 64], strides = [1, 1]} : vector<8x256xf32> to vector<8x64xf32>
    %25 = vector.extract_strided_slice %23 {offsets = [0, 128], sizes = [8, 64], strides = [1, 1]} : vector<8x256xf32> to vector<8x64xf32>
    %26 = vector.extract_strided_slice %22 {offsets = [0, 192], sizes = [8, 64], strides = [1, 1]} : vector<8x256xf32> to vector<8x64xf32>
    %27 = arith.mulf %24, %25 : vector<8x64xf32>
    %28 = arith.mulf %27, %15 : vector<8x64xf32>
    %29 = math.tanh %28 : vector<8x64xf32>
    %30 = arith.mulf %26, %29 : vector<8x64xf32>
    %31 = vector.extract_strided_slice %10 {offsets = [1, 0, 0], sizes = [1, 8, 256], strides = [1, 1, 1]} : vector<8x8x256xf32> to vector<1x8x256xf32>
    %32 = vector.shape_cast %31 : vector<1x8x256xf32> to vector<8x256xf32>
    %33 = arith.truncf %30 : vector<8x64xf32> to vector<8x64xbf16>
    %cst_8 = arith.constant dense<0.000000e+00> : vector<8x256xf32>
    %34 = tpu.matmul %33, %2, %cst_8 {dimension_numbers = #tpu.dot_dimension_numbers<[1], [0], [0], [1], [0, 0, 1, 1], [], []>} : vector<8x64xbf16>, vector<64x256xbf16>, vector<8x256xf32> -> vector<8x256xf32>
    %35 = arith.addf %34, %32 : vector<8x256xf32>
    %36 = arith.negf %35 : vector<8x256xf32>
    %37 = math.exp %36 : vector<8x256xf32>
    %cst_9 = arith.constant 1.000000e+00 : f32
    %38 = vector.broadcast %cst_9 : f32 to vector<8x256xf32>
    %39 = arith.addf %38, %37 : vector<8x256xf32>
    %40 = arith.divf %38, %39 : vector<8x256xf32>
    %41 = math.tanh %35 : vector<8x256xf32>
    %42 = vector.extract_strided_slice %40 {offsets = [0, 0], sizes = [8, 64], strides = [1, 1]} : vector<8x256xf32> to vector<8x64xf32>
    %43 = vector.extract_strided_slice %40 {offsets = [0, 64], sizes = [8, 64], strides = [1, 1]} : vector<8x256xf32> to vector<8x64xf32>
    %44 = vector.extract_strided_slice %41 {offsets = [0, 128], sizes = [8, 64], strides = [1, 1]} : vector<8x256xf32> to vector<8x64xf32>
    %45 = vector.extract_strided_slice %40 {offsets = [0, 192], sizes = [8, 64], strides = [1, 1]} : vector<8x256xf32> to vector<8x64xf32>
    %46 = arith.mulf %43, %28 : vector<8x64xf32>
    %47 = arith.mulf %42, %44 : vector<8x64xf32>
    %48 = arith.addf %46, %47 : vector<8x64xf32>
    %49 = math.tanh %48 : vector<8x64xf32>
    %50 = arith.mulf %45, %49 : vector<8x64xf32>
    %51 = vector.extract_strided_slice %10 {offsets = [2, 0, 0], sizes = [1, 8, 256], strides = [1, 1, 1]} : vector<8x8x256xf32> to vector<1x8x256xf32>
    %52 = vector.shape_cast %51 : vector<1x8x256xf32> to vector<8x256xf32>
    %53 = arith.truncf %50 : vector<8x64xf32> to vector<8x64xbf16>
    %cst_10 = arith.constant dense<0.000000e+00> : vector<8x256xf32>
    %54 = tpu.matmul %53, %2, %cst_10 {dimension_numbers = #tpu.dot_dimension_numbers<[1], [0], [0], [1], [0, 0, 1, 1], [], []>} : vector<8x64xbf16>, vector<64x256xbf16>, vector<8x256xf32> -> vector<8x256xf32>
    %55 = arith.addf %54, %52 : vector<8x256xf32>
    %56 = arith.negf %55 : vector<8x256xf32>
    %57 = math.exp %56 : vector<8x256xf32>
    %cst_11 = arith.constant 1.000000e+00 : f32
    %58 = vector.broadcast %cst_11 : f32 to vector<8x256xf32>
    %59 = arith.addf %58, %57 : vector<8x256xf32>
    %60 = arith.divf %58, %59 : vector<8x256xf32>
    %61 = math.tanh %55 : vector<8x256xf32>
    %62 = vector.extract_strided_slice %60 {offsets = [0, 0], sizes = [8, 64], strides = [1, 1]} : vector<8x256xf32> to vector<8x64xf32>
    %63 = vector.extract_strided_slice %60 {offsets = [0, 64], sizes = [8, 64], strides = [1, 1]} : vector<8x256xf32> to vector<8x64xf32>
    %64 = vector.extract_strided_slice %61 {offsets = [0, 128], sizes = [8, 64], strides = [1, 1]} : vector<8x256xf32> to vector<8x64xf32>
    %65 = vector.extract_strided_slice %60 {offsets = [0, 192], sizes = [8, 64], strides = [1, 1]} : vector<8x256xf32> to vector<8x64xf32>
    %66 = arith.mulf %63, %48 : vector<8x64xf32>
    %67 = arith.mulf %62, %64 : vector<8x64xf32>
    %68 = arith.addf %66, %67 : vector<8x64xf32>
    %69 = math.tanh %68 : vector<8x64xf32>
    %70 = arith.mulf %65, %69 : vector<8x64xf32>
    %71 = vector.extract_strided_slice %10 {offsets = [3, 0, 0], sizes = [1, 8, 256], strides = [1, 1, 1]} : vector<8x8x256xf32> to vector<1x8x256xf32>
    %72 = vector.shape_cast %71 : vector<1x8x256xf32> to vector<8x256xf32>
    %73 = arith.truncf %70 : vector<8x64xf32> to vector<8x64xbf16>
    %cst_12 = arith.constant dense<0.000000e+00> : vector<8x256xf32>
    %74 = tpu.matmul %73, %2, %cst_12 {dimension_numbers = #tpu.dot_dimension_numbers<[1], [0], [0], [1], [0, 0, 1, 1], [], []>} : vector<8x64xbf16>, vector<64x256xbf16>, vector<8x256xf32> -> vector<8x256xf32>
    %75 = arith.addf %74, %72 : vector<8x256xf32>
    %76 = arith.negf %75 : vector<8x256xf32>
    %77 = math.exp %76 : vector<8x256xf32>
    %cst_13 = arith.constant 1.000000e+00 : f32
    %78 = vector.broadcast %cst_13 : f32 to vector<8x256xf32>
    %79 = arith.addf %78, %77 : vector<8x256xf32>
    %80 = arith.divf %78, %79 : vector<8x256xf32>
    %81 = math.tanh %75 : vector<8x256xf32>
    %82 = vector.extract_strided_slice %80 {offsets = [0, 0], sizes = [8, 64], strides = [1, 1]} : vector<8x256xf32> to vector<8x64xf32>
    %83 = vector.extract_strided_slice %80 {offsets = [0, 64], sizes = [8, 64], strides = [1, 1]} : vector<8x256xf32> to vector<8x64xf32>
    %84 = vector.extract_strided_slice %81 {offsets = [0, 128], sizes = [8, 64], strides = [1, 1]} : vector<8x256xf32> to vector<8x64xf32>
    %85 = vector.extract_strided_slice %80 {offsets = [0, 192], sizes = [8, 64], strides = [1, 1]} : vector<8x256xf32> to vector<8x64xf32>
    %86 = arith.mulf %83, %68 : vector<8x64xf32>
    %87 = arith.mulf %82, %84 : vector<8x64xf32>
    %88 = arith.addf %86, %87 : vector<8x64xf32>
    %89 = math.tanh %88 : vector<8x64xf32>
    %90 = arith.mulf %85, %89 : vector<8x64xf32>
    %91 = vector.extract_strided_slice %10 {offsets = [4, 0, 0], sizes = [1, 8, 256], strides = [1, 1, 1]} : vector<8x8x256xf32> to vector<1x8x256xf32>
    %92 = vector.shape_cast %91 : vector<1x8x256xf32> to vector<8x256xf32>
    %93 = arith.truncf %90 : vector<8x64xf32> to vector<8x64xbf16>
    %cst_14 = arith.constant dense<0.000000e+00> : vector<8x256xf32>
    %94 = tpu.matmul %93, %2, %cst_14 {dimension_numbers = #tpu.dot_dimension_numbers<[1], [0], [0], [1], [0, 0, 1, 1], [], []>} : vector<8x64xbf16>, vector<64x256xbf16>, vector<8x256xf32> -> vector<8x256xf32>
    %95 = arith.addf %94, %92 : vector<8x256xf32>
    %96 = arith.negf %95 : vector<8x256xf32>
    %97 = math.exp %96 : vector<8x256xf32>
    %cst_15 = arith.constant 1.000000e+00 : f32
    %98 = vector.broadcast %cst_15 : f32 to vector<8x256xf32>
    %99 = arith.addf %98, %97 : vector<8x256xf32>
    %100 = arith.divf %98, %99 : vector<8x256xf32>
    %101 = math.tanh %95 : vector<8x256xf32>
    %102 = vector.extract_strided_slice %100 {offsets = [0, 0], sizes = [8, 64], strides = [1, 1]} : vector<8x256xf32> to vector<8x64xf32>
    %103 = vector.extract_strided_slice %100 {offsets = [0, 64], sizes = [8, 64], strides = [1, 1]} : vector<8x256xf32> to vector<8x64xf32>
    %104 = vector.extract_strided_slice %101 {offsets = [0, 128], sizes = [8, 64], strides = [1, 1]} : vector<8x256xf32> to vector<8x64xf32>
    %105 = vector.extract_strided_slice %100 {offsets = [0, 192], sizes = [8, 64], strides = [1, 1]} : vector<8x256xf32> to vector<8x64xf32>
    %106 = arith.mulf %103, %88 : vector<8x64xf32>
    %107 = arith.mulf %102, %104 : vector<8x64xf32>
    %108 = arith.addf %106, %107 : vector<8x64xf32>
    %109 = math.tanh %108 : vector<8x64xf32>
    %110 = arith.mulf %105, %109 : vector<8x64xf32>
    %111 = vector.extract_strided_slice %10 {offsets = [5, 0, 0], sizes = [1, 8, 256], strides = [1, 1, 1]} : vector<8x8x256xf32> to vector<1x8x256xf32>
    %112 = vector.shape_cast %111 : vector<1x8x256xf32> to vector<8x256xf32>
    %113 = arith.truncf %110 : vector<8x64xf32> to vector<8x64xbf16>
    %cst_16 = arith.constant dense<0.000000e+00> : vector<8x256xf32>
    %114 = tpu.matmul %113, %2, %cst_16 {dimension_numbers = #tpu.dot_dimension_numbers<[1], [0], [0], [1], [0, 0, 1, 1], [], []>} : vector<8x64xbf16>, vector<64x256xbf16>, vector<8x256xf32> -> vector<8x256xf32>
    %115 = arith.addf %114, %112 : vector<8x256xf32>
    %116 = arith.negf %115 : vector<8x256xf32>
    %117 = math.exp %116 : vector<8x256xf32>
    %cst_17 = arith.constant 1.000000e+00 : f32
    %118 = vector.broadcast %cst_17 : f32 to vector<8x256xf32>
    %119 = arith.addf %118, %117 : vector<8x256xf32>
    %120 = arith.divf %118, %119 : vector<8x256xf32>
    %121 = math.tanh %115 : vector<8x256xf32>
    %122 = vector.extract_strided_slice %120 {offsets = [0, 0], sizes = [8, 64], strides = [1, 1]} : vector<8x256xf32> to vector<8x64xf32>
    %123 = vector.extract_strided_slice %120 {offsets = [0, 64], sizes = [8, 64], strides = [1, 1]} : vector<8x256xf32> to vector<8x64xf32>
    %124 = vector.extract_strided_slice %121 {offsets = [0, 128], sizes = [8, 64], strides = [1, 1]} : vector<8x256xf32> to vector<8x64xf32>
    %125 = vector.extract_strided_slice %120 {offsets = [0, 192], sizes = [8, 64], strides = [1, 1]} : vector<8x256xf32> to vector<8x64xf32>
    %126 = arith.mulf %123, %108 : vector<8x64xf32>
    %127 = arith.mulf %122, %124 : vector<8x64xf32>
    %128 = arith.addf %126, %127 : vector<8x64xf32>
    %129 = math.tanh %128 : vector<8x64xf32>
    %130 = arith.mulf %125, %129 : vector<8x64xf32>
    %131 = vector.extract_strided_slice %10 {offsets = [6, 0, 0], sizes = [1, 8, 256], strides = [1, 1, 1]} : vector<8x8x256xf32> to vector<1x8x256xf32>
    %132 = vector.shape_cast %131 : vector<1x8x256xf32> to vector<8x256xf32>
    %133 = arith.truncf %130 : vector<8x64xf32> to vector<8x64xbf16>
    %cst_18 = arith.constant dense<0.000000e+00> : vector<8x256xf32>
    %134 = tpu.matmul %133, %2, %cst_18 {dimension_numbers = #tpu.dot_dimension_numbers<[1], [0], [0], [1], [0, 0, 1, 1], [], []>} : vector<8x64xbf16>, vector<64x256xbf16>, vector<8x256xf32> -> vector<8x256xf32>
    %135 = arith.addf %134, %132 : vector<8x256xf32>
    %136 = arith.negf %135 : vector<8x256xf32>
    %137 = math.exp %136 : vector<8x256xf32>
    %cst_19 = arith.constant 1.000000e+00 : f32
    %138 = vector.broadcast %cst_19 : f32 to vector<8x256xf32>
    %139 = arith.addf %138, %137 : vector<8x256xf32>
    %140 = arith.divf %138, %139 : vector<8x256xf32>
    %141 = math.tanh %135 : vector<8x256xf32>
    %142 = vector.extract_strided_slice %140 {offsets = [0, 0], sizes = [8, 64], strides = [1, 1]} : vector<8x256xf32> to vector<8x64xf32>
    %143 = vector.extract_strided_slice %140 {offsets = [0, 64], sizes = [8, 64], strides = [1, 1]} : vector<8x256xf32> to vector<8x64xf32>
    %144 = vector.extract_strided_slice %141 {offsets = [0, 128], sizes = [8, 64], strides = [1, 1]} : vector<8x256xf32> to vector<8x64xf32>
    %145 = vector.extract_strided_slice %140 {offsets = [0, 192], sizes = [8, 64], strides = [1, 1]} : vector<8x256xf32> to vector<8x64xf32>
    %146 = arith.mulf %143, %128 : vector<8x64xf32>
    %147 = arith.mulf %142, %144 : vector<8x64xf32>
    %148 = arith.addf %146, %147 : vector<8x64xf32>
    %149 = math.tanh %148 : vector<8x64xf32>
    %150 = arith.mulf %145, %149 : vector<8x64xf32>
    %151 = vector.extract_strided_slice %10 {offsets = [7, 0, 0], sizes = [1, 8, 256], strides = [1, 1, 1]} : vector<8x8x256xf32> to vector<1x8x256xf32>
    %152 = vector.shape_cast %151 : vector<1x8x256xf32> to vector<8x256xf32>
    %153 = arith.truncf %150 : vector<8x64xf32> to vector<8x64xbf16>
    %cst_20 = arith.constant dense<0.000000e+00> : vector<8x256xf32>
    %154 = tpu.matmul %153, %2, %cst_20 {dimension_numbers = #tpu.dot_dimension_numbers<[1], [0], [0], [1], [0, 0, 1, 1], [], []>} : vector<8x64xbf16>, vector<64x256xbf16>, vector<8x256xf32> -> vector<8x256xf32>
    %155 = arith.addf %154, %152 : vector<8x256xf32>
    %156 = arith.negf %155 : vector<8x256xf32>
    %157 = math.exp %156 : vector<8x256xf32>
    %cst_21 = arith.constant 1.000000e+00 : f32
    %158 = vector.broadcast %cst_21 : f32 to vector<8x256xf32>
    %159 = arith.addf %158, %157 : vector<8x256xf32>
    %160 = arith.divf %158, %159 : vector<8x256xf32>
    %161 = math.tanh %155 : vector<8x256xf32>
    %162 = vector.extract_strided_slice %160 {offsets = [0, 0], sizes = [8, 64], strides = [1, 1]} : vector<8x256xf32> to vector<8x64xf32>
    %163 = vector.extract_strided_slice %160 {offsets = [0, 64], sizes = [8, 64], strides = [1, 1]} : vector<8x256xf32> to vector<8x64xf32>
    %164 = vector.extract_strided_slice %161 {offsets = [0, 128], sizes = [8, 64], strides = [1, 1]} : vector<8x256xf32> to vector<8x64xf32>
    %165 = vector.extract_strided_slice %160 {offsets = [0, 192], sizes = [8, 64], strides = [1, 1]} : vector<8x256xf32> to vector<8x64xf32>
    %166 = arith.mulf %163, %148 : vector<8x64xf32>
    %167 = arith.mulf %162, %164 : vector<8x64xf32>
    %168 = arith.addf %166, %167 : vector<8x64xf32>
    %169 = math.tanh %168 : vector<8x64xf32>
    %170 = arith.mulf %165, %169 : vector<8x64xf32>
    %171 = arith.truncf %170 : vector<8x64xf32> to vector<8x64xbf16>
    %cst_22 = arith.constant dense<0.000000e+00> : vector<8x256xf32>
    %172 = tpu.matmul %171, %2, %cst_22 {dimension_numbers = #tpu.dot_dimension_numbers<[1], [0], [0], [1], [0, 0, 1, 1], [], []>} : vector<8x64xbf16>, vector<64x256xbf16>, vector<8x256xf32> -> vector<8x256xf32>
    %173 = vector.broadcast %1 : vector<1x256xf32> to vector<8x256xf32>
    %174 = arith.addf %172, %173 : vector<8x256xf32>
    %175 = arith.negf %174 : vector<8x256xf32>
    %176 = math.exp %175 : vector<8x256xf32>
    %cst_23 = arith.constant 1.000000e+00 : f32
    %177 = vector.broadcast %cst_23 : f32 to vector<8x256xf32>
    %178 = arith.addf %177, %176 : vector<8x256xf32>
    %179 = arith.divf %177, %178 : vector<8x256xf32>
    %180 = math.tanh %174 : vector<8x256xf32>
    %181 = vector.extract_strided_slice %179 {offsets = [0, 0], sizes = [8, 64], strides = [1, 1]} : vector<8x256xf32> to vector<8x64xf32>
    %182 = vector.extract_strided_slice %179 {offsets = [0, 64], sizes = [8, 64], strides = [1, 1]} : vector<8x256xf32> to vector<8x64xf32>
    %183 = vector.extract_strided_slice %180 {offsets = [0, 128], sizes = [8, 64], strides = [1, 1]} : vector<8x256xf32> to vector<8x64xf32>
    %184 = vector.extract_strided_slice %179 {offsets = [0, 192], sizes = [8, 64], strides = [1, 1]} : vector<8x256xf32> to vector<8x64xf32>
    %185 = arith.mulf %182, %168 : vector<8x64xf32>
    %186 = arith.mulf %181, %183 : vector<8x64xf32>
    %187 = arith.addf %185, %186 : vector<8x64xf32>
    %188 = math.tanh %187 : vector<8x64xf32>
    %189 = arith.mulf %184, %188 : vector<8x64xf32>
    %190 = vector.extract_strided_slice %189 {offsets = [0, 32], sizes = [8, 32], strides = [1, 1]} : vector<8x64xf32> to vector<8x32xf32>
    %c0_24 = arith.constant 0 : index
    %c0_25 = arith.constant 0 : index
    %191 = vector.load %arg4[%c0_24, %c0_25] : memref<1x32xf32, #tpu.memory_space<vmem>>, vector<1x32xf32>
    %192 = vector.broadcast %191 : vector<1x32xf32> to vector<8x32xf32>
    %193 = arith.mulf %190, %192 : vector<8x32xf32>
    %cst_26 = arith.constant dense<0.000000e+00> : vector<8xf32>
    %194 = vector.multi_reduction <add>, %193, %cst_26 [1] : vector<8x32xf32> to vector<8xf32>
    %195 = vector.shape_cast %194 : vector<8xf32> to vector<8x1xf32>
    %c0_27 = arith.constant 0 : index
    %c0_28 = arith.constant 0 : index
    %196 = vector.load %arg5[%c0_27, %c0_28] : memref<1x1xf32, #tpu.memory_space<vmem>>, vector<1x1xf32>
    %197 = vector.broadcast %196 : vector<1x1xf32> to vector<8x1xf32>
    %198 = arith.addf %195, %197 : vector<8x1xf32>
    %c0_29 = arith.constant 0 : index
    %c0_30 = arith.constant 0 : index
    %199 = vector.load %arg6[%c0_29, %c0_30] : memref<8x1xf32, #tpu.memory_space<vmem>>, vector<8x1xf32>
    tpu.vector_store %arg6[%c0_29, %c0_30], %198 {strides = array<i32>} : memref<8x1xf32, #tpu.memory_space<vmem>>, vector<8x1xf32>,
    return
  }
}

</mosaic_0001>

<bundles_post_ra>
// kernel: lstm_forward.1
= control target key start
LH: loop header
LB: loop body
LE: loop exit
PB: predicated region body
PF: predicated region fallthrough
CT: control target
= control target key end

     0   :  { %v1089_v0 = vmov 0   ;;  %v126_v15 = vlaneseq  ;;  %v1090_v28 = vmov 0.0   ;;  %vm222_vm9 = vcmask 523264   ;;  %s1092_s23 = smov 96   ;;  %s1384_s0 = inlined_call_operand.vmem [shape: f32[8,8,1], index: 0, kind: input, shape index: {}]   ;;  %s1385_s1 = inlined_call_operand.vmem [shape: f32[1,256], index: 1, kind: input, shape index: {}]   ;;  %s1386_s2 = inlined_call_operand.vmem [shape: f32[1,256], index: 2, kind: input, shape index: {}]   ;;  %s1387_s3 = inlined_call_operand.vmem [shape: bf16[64,256], index: 3, kind: input, shape index: {}]   ;;  %s1388_s4 = inlined_call_operand.vmem [shape: f32[1,32], index: 4, kind: input, shape index: {}]   ;;  %s1389_s5 = inlined_call_operand.<no memory space> [shape: f32[1,1], index: 5, kind: input, shape index: {}]   ;;  %s1390_s6 = inlined_call_operand.vmem [shape: f32[8,1], index: 6, kind: output, shape index: {}]  }
   0x1   :  { %977 = vset.pattern.permute.xlu0 %v1089_v0  ;;  %v36_v1 = vld [vmem:[%s1384_s0] sm:$0xff]  ;;  %978 = vset.pattern.permute.xlu1 %v1089_v0  ;;  %v926_v50 = vld [vmem:[%s1387_s3 + $0x30] sm:$0xf]  ;;  %v971_v51 = vld [vmem:[%s1387_s3 + $0x34] sm:$0xf0] }
   0x2   :  { %46 = vperm.xlu0 %977, %v36_v1   ;;  %v26_v2 = vld [vmem:[%s1385_s1] sm:$0x3]  ;;  %v127_v19 = vand.u32 127, %v126_v15  ;;  %s1091_s1 = smov 64   ;;  %v970_v52 = vld [vmem:[%s1387_s3 + $0x34] sm:$0xf]  ;;  %v1162_v53 = vor.u32 %v971_v51, %v926_v50 }
   0x3   :  { %v27_v3 = vld [vmem:[%s1386_s2] sm:$0x3]  ;;  %v1138_v4 = vperm.slane %v26_v2, 0  ;;  %v1144_v11 = vperm.slane %v26_v2, 1  ;;  %v928_v54 = vld [vmem:[%s1387_s3 + $0x38] sm:$0xf0] }
   0x4   :  { %v1140_v5 = vperm.slane %v27_v3, 0  ;;  %v1146_v13 = vperm.slane %v27_v3, 1  ;;  %vm128_vm1 = vcmp.lt.s32.totalorder %v127_v19, 32  ;;  %v918_v55 = vld [vmem:[%s1387_s3 + $0x20] sm:$0xf]  ;;  %v1173_v57 = vor.u32 %v970_v52, %v928_v54  ;;  %230 = vmatpush.bf16.msra.mxu0 %v1162_v53  ;;  %315 = vmatpush.bf16.msra.mxu2 %v1162_v53  ;;  %v37_v62 = vld [vmem:[%s1384_s0 + $0x8] sm:$0xff] }
   0x5   :  { %v897_v29 = vsel %vm128_vm1, 1.0, %v1090_v28  ;;  %v969_v56 = vld [vmem:[%s1387_s3 + $0x24] sm:$0xf0]  ;;  %v968_v58 = vld [vmem:[%s1387_s3 + $0x24] sm:$0xf]  ;;  %v38_v15 = vld [vmem:[%s1384_s0 + $0x10] sm:$0xff] }
   0x6   :  { %v920_v59 = vld [vmem:[%s1387_s3 + $0x28] sm:$0xf0]  ;;  %v1182_v60 = vor.u32 %v969_v56, %v918_v55  ;;  %243 = vmatpush.bf16.msra.mxu1 %v1173_v57  ;;  %328 = vmatpush.bf16.msra.mxu3 %v1173_v57  ;;  %v910_v63 = vld [vmem:[%s1387_s3 + $0x10] sm:$0xf]  ;;  %v967_v0 = vld [vmem:[%s1387_s3 + $0x14] sm:$0xf0] }
   0x7   :  { %v1186_v61 = vor.u32 %v968_v58, %v920_v59  ;;  %v966_v1 = vld [vmem:[%s1387_s3 + $0x14] sm:$0xf]  ;;  %v1204_v2 = vor.u32 %v967_v0, %v910_v63  ;;  %v912_v3 = vld [vmem:[%s1387_s3 + $0x18] sm:$0xf0] }
   0x8   :  { %231 = vmatpush.bf16.msra.mxu0 %v1182_v60  ;;  %316 = vmatpush.bf16.msra.mxu2 %v1182_v60  ;;  %v42_v19 = vld [vmem:[%s1384_s0 + $0x30] sm:$0xff] }
   0xa   :  { %244 = vmatpush.bf16.msra.mxu1 %v1186_v61  ;;  %329 = vmatpush.bf16.msra.mxu3 %v1186_v61 }
   0xc   :  { %232 = vmatpush.bf16.msra.mxu0 %v1204_v2  ;;  %317 = vmatpush.bf16.msra.mxu2 %v1204_v2 }
  0x74   :  { %v47_v6 = vpop.permute.xlu0 %46 }
  0x75   :  { %v89_v7 = vmul.f32 %v1138_v4, %v47_v6  ;;  %v90_v14 = vmul.f32 %v1144_v11, %v47_v6  ;;  %v902_v6 = vld [vmem:[%s1387_s3] sm:$0xf] }
  0x77   :  { %v110_v8 = vadd.f32 %v1140_v5, %v89_v7  ;;  %v111_v17 = vadd.f32 %v1146_v13, %v90_v14  ;;  %v965_v7 = vld [vmem:[%s1387_s3 + $0x4] sm:$0xf0] }
  0x79   :  { %v898_v9 = vmul.f32 -1.442695, %v110_v8  ;;  %v899_v34 = vmul.f32 -1.442695, %v111_v17  ;;  %v1216_v8 = vor.u32 %v966_v1, %v912_v3 }
  0x7b   :  { %981 = vpow2.f32 %v898_v9  ;;  %v964_v9 = vld [vmem:[%s1387_s3 + $0x4] sm:$0xf]  ;;  %245 = vmatpush.bf16.msra.mxu1 %v1216_v8  ;;  %330 = vmatpush.bf16.msra.mxu3 %v1216_v8 }
  0x81   :  { %v982_v10 = vpop.eup %981 }
  0x82   :  { %v137_v12 = vadd.f32 1.0, %v982_v10  ;;  %v904_v10 = vld [vmem:[%s1387_s3 + $0x8] sm:$0xf0] }
  0x83   :  { %v1229_v14 = vor.u32 %v964_v9, %v904_v10 }
  0x84   :  { %983 = vrcp.f32 %v137_v12  ;;  %v150_v21 = vand.u32 2147483648, %v137_v12  ;;  %v148_v23 = vand.u32 2147483647, %v137_v12  ;;  %vm144_vm2 = vweird.f32 %v137_v12 }
  0x85   :  { %985 = vtanh.f32 %v111_v17  ;;  %246 = vmatpush.bf16.msra.mxu1 %v1229_v14  ;;  %331 = vmatpush.bf16.msra.mxu3 %v1229_v14  ;;  %v40_v17 = vld [vmem:[%s1384_s0 + $0x20] sm:$0xff] }
  0x86   :  { %v151_v25 = vor.u32 1.1754944e-38, %v150_v21  ;;  %vm149_vm4 = vcmp.eq.f32.partialorder %v148_v23, 8.507059e+37 }
  0x89   :  { %409 = vmatpush.bf16.msrb.mxu1 %v1173_v57  ;;  %490 = vmatpush.bf16.msrb.mxu3 %v1173_v57 }
  0x8a   :  { %v984_v16 = vpop.eup %983 }
  0x8b   :  { %v140_v18 = vmul.f32 %v984_v16, %v137_v12  ;;  %vm145_vm0 = vweird.f32 %v984_v16  ;;  %v986_v27 = vpop.eup %985  ;;  %v1225_v12 = vor.u32 %v965_v7, %v902_v6 }
  0x8c   :  { %vm146_vm3 = vmor %vm144_vm2, %vm145_vm0 }
  0x8d   :  { %v141_v20 = vsub.f32 1.0, %v140_v18  ;;  %233 = vmatpush.bf16.msra.mxu0 %v1225_v12  ;;  %318 = vmatpush.bf16.msra.mxu2 %v1225_v12  ;;  %v41_v18 = vld [vmem:[%s1384_s0 + $0x28] sm:$0xff] }
  0x8e   :  { %410 = vmatpush.bf16.msrb.mxu1 %v1186_v61  ;;  %491 = vmatpush.bf16.msrb.mxu3 %v1186_v61 }
  0x8f   :  { %v142_v22 = vmul.f32 %v984_v16, %v141_v20  ;;  %v43_v20 = vld [vmem:[%s1384_s0 + $0x38] sm:$0xff] }
  0x91   :  { %v143_v24 = vadd.f32 %v984_v16, %v142_v22  ;;  %396 = vmatpush.bf16.msrb.mxu0 %v1162_v53  ;;  %477 = vmatpush.bf16.msrb.mxu2 %v1162_v53 }
  0x92   :  { %411 = vmatpush.bf16.msrb.mxu1 %v1216_v8  ;;  %492 = vmatpush.bf16.msrb.mxu3 %v1216_v8 }
  0x93   :  { %v147_v26 = vsel %vm146_vm3, %v984_v16, %v143_v24  ;;  %v39_v16 = vld [vmem:[%s1384_s0 + $0x18] sm:$0xff] }
  0x94   :  { %v152_v30 = vsel %vm149_vm4, %v151_v25, %v147_v26 }
  0x95   :  { %v170_v31 = vmul.f32 %v986_v27, %v152_v30  ;;  %397 = vmatpush.bf16.msrb.mxu0 %v1182_v60  ;;  %478 = vmatpush.bf16.msrb.mxu2 %v1182_v60 }
  0x96   :  { %412 = vmatpush.bf16.msrb.mxu1 %v1229_v14  ;;  %493 = vmatpush.bf16.msrb.mxu3 %v1229_v14 }
  0x97   :  { %v171_v32 = vmul.f32 %v897_v29, %v170_v31 }
  0x99   :  { %292 = vrot.lane.b32.xlu2 %v171_v32, %s1091_s1  ;;  %987 = vtanh.f32 %v171_v32  ;;  %398 = vmatpush.bf16.msrb.mxu0 %v1204_v2 }
  0x9a   :  { %989 = vpow2.f32 %v899_v34  ;;  %479 = vmatpush.bf16.msrb.mxu2 %v1204_v2 }
  0x9d   :  { %399 = vmatpush.bf16.msrb.mxu0 %v1225_v12 }
  0x9e   :  { %480 = vmatpush.bf16.msrb.mxu2 %v1225_v12 }
  0x9f   :  { %v988_v33 = vpop.eup %987 }
  0xa0   :  { %174 = vrot.lane.b32.xlu0 %v988_v33, %s1091_s1  ;;  %v990_v35 = vpop.eup %989 }
  0xa1   :  { %v138_v36 = vadd.f32 1.0, %v990_v35 }
  0xa3   :  { %991 = vrcp.f32 %v138_v36  ;;  %v165_v42 = vand.u32 2147483648, %v138_v36  ;;  %vm159_vm6 = vweird.f32 %v138_v36  ;;  %v163_v43 = vand.u32 2147483647, %v138_v36 }
  0xa5   :  { %v166_v45 = vor.u32 1.1754944e-38, %v165_v42  ;;  %vm164_vm8 = vcmp.eq.f32.partialorder %v163_v43, 8.507059e+37 }
  0xa9   :  { %v992_v37 = vpop.eup %991 }
  0xaa   :  { %v155_v38 = vmul.f32 %v992_v37, %v138_v36  ;;  %vm160_vm5 = vweird.f32 %v992_v37 }
  0xab   :  { %vm161_vm7 = vmor %vm159_vm6, %vm160_vm5 }
  0xac   :  { %v156_v39 = vsub.f32 1.0, %v155_v38 }
  0xae   :  { %v157_v40 = vmul.f32 %v992_v37, %v156_v39 }
  0xb0   :  { %v158_v41 = vadd.f32 %v992_v37, %v157_v40 }
  0xb2   :  { %v162_v44 = vsel %vm161_vm7, %v992_v37, %v158_v41 }
  0xb3   :  { %v167_v46 = vsel %vm164_vm8, %v166_v45, %v162_v44 }
  0xf3   :  { %v293_v54 = vpop.permute.xlu2 %292 }
 0x112   :  { %v175_v47 = vpop.permute.xlu0 %174 }
 0x113   :  { %v177_v48 = vmul.f32 %v175_v47, %v167_v46 }
 0x115   :  { %v178_v49 = vpack.c.bf16 %v177_v48, %v177_v48 }
 0x117   :  { %180 = vrot.lane.b32.xlu1 %v178_v49, %s1091_s1 }
 0x11f   :  { %51 = vperm.xlu1 %978, %v37_v62  }
 0x127   :  { %56 = vperm.xlu1 %978, %v38_v15  }
 0x12f   :  { %61 = vperm.xlu1 %978, %v39_v16  }
 0x137   :  { %66 = vperm.xlu1 %978, %v40_v17  }
 0x13f   :  { %71 = vperm.xlu1 %978, %v41_v18  }
 0x147   :  { %76 = vperm.xlu1 %978, %v42_v19  }
 0x14f   :  { %81 = vperm.xlu1 %978, %v43_v20  }
 0x189   :  { %v181_v21 = vpop.permute.xlu1 %180 }
 0x18a   :  { %932 = vmatmul.msk.bf16.vlgmr.msra.gmra.mxu0 %vm222_vm9, %v181_v21  ;;  %933 = vmatmul.msk.bf16.vlgmr.msra.gmra.mxu1 %vm222_vm9, %v181_v21 }
 0x18b   :  { %558 = vmatpush.bf16.msra.mxu0 %v1162_v53  ;;  %571 = vmatpush.bf16.msra.mxu1 %v1173_v57 }
 0x18f   :  { %559 = vmatpush.bf16.msra.mxu0 %v1182_v60  ;;  %572 = vmatpush.bf16.msra.mxu1 %v1186_v61 }
 0x191   :  { %v52_v22 = vpop.permute.xlu1 %51 }
 0x192   :  { %v91_v23 = vmul.f32 %v1138_v4, %v52_v22  ;;  %v92_v32 = vmul.f32 %v1144_v11, %v52_v22 }
 0x193   :  { %560 = vmatpush.bf16.msra.mxu0 %v1204_v2  ;;  %573 = vmatpush.bf16.msra.mxu1 %v1216_v8 }
 0x194   :  { %v112_v24 = vadd.f32 %v1140_v5, %v91_v23  ;;  %v113_v34 = vadd.f32 %v1146_v13, %v92_v32 }
 0x197   :  { %561 = vmatpush.bf16.msra.mxu0 %v1225_v12  ;;  %574 = vmatpush.bf16.msra.mxu1 %v1229_v14 }
 0x199   :  { %v57_v17 = vpop.permute.xlu1 %56 }
 0x19a   :  { %v93_v18 = vmul.f32 %v1138_v4, %v57_v17 }
 0x19c   :  { %v114_v19 = vadd.f32 %v1140_v5, %v93_v18 }
 0x207   :  { %v235_v25 = vpop.f32.mrf.mxu0  ;;  %v248_v26 = vpop.f32.mrf.mxu1 }
 0x208   :  { %v236_v27 = vadd.f32 %v235_v25, %v112_v24  ;;  %v249_v36 = vadd.f32 %v248_v26, %v113_v34 }
 0x20a   :  { %v934_v28 = vmul.f32 -1.442695, %v236_v27  ;;  %v935_v48 = vmul.f32 -1.442695, %v249_v36 }
 0x20c   :  { %993 = vpow2.f32 %v934_v28  ;;  %v94_v28 = vmul.f32 %v1144_v11, %v57_v17 }
 0x20f   :  { %v237_v29 = vpop.f32.mrf.mxu0  ;;  %v250_v30 = vpop.f32.mrf.mxu1 }
 0x210   :  { %v115_v29 = vadd.f32 %v1146_v13, %v94_v28 }
 0x212   :  { %v994_v31 = vpop.eup %993 }
 0x213   :  { %v258_v33 = vadd.f32 1.0, %v994_v31 }
 0x215   :  { %995 = vrcp.f32 %v258_v33  ;;  %v271_v39 = vand.u32 2147483648, %v258_v33  ;;  %v269_v41 = vand.u32 2147483647, %v258_v33  ;;  %vm265_vm11 = vweird.f32 %v258_v33 }
 0x216   :  { %997 = vtanh.f32 %v249_v36 }
 0x217   :  { %v272_v43 = vor.u32 1.1754944e-38, %v271_v39  ;;  %vm270_vm13 = vcmp.eq.f32.partialorder %v269_v41, 8.507059e+37  ;;  %999 = vpow2.f32 %v935_v48 }
 0x21b   :  { %v996_v35 = vpop.eup %995 }
 0x21c   :  { %v261_v37 = vmul.f32 %v996_v35, %v258_v33  ;;  %vm266_vm10 = vweird.f32 %v996_v35  ;;  %v998_v45 = vpop.eup %997 }
 0x21d   :  { %vm267_vm12 = vmor %vm265_vm11, %vm266_vm10  ;;  %v1000_v49 = vpop.eup %999 }
 0x21e   :  { %v262_v38 = vsub.f32 1.0, %v261_v37  ;;  %v259_v50 = vadd.f32 1.0, %v1000_v49 }
 0x220   :  { %v263_v40 = vmul.f32 %v996_v35, %v262_v38  ;;  %1001 = vrcp.f32 %v259_v50  ;;  %v286_v0 = vand.u32 2147483648, %v259_v50  ;;  %vm280_vm15 = vweird.f32 %v259_v50 }
 0x221   :  { %v284_v1 = vand.u32 2147483647, %v259_v50 }
 0x222   :  { %v264_v42 = vadd.f32 %v996_v35, %v263_v40  ;;  %v287_v6 = vor.u32 1.1754944e-38, %v286_v0 }
 0x223   :  { %vm285_vm1 = vcmp.eq.f32.partialorder %v284_v1, 8.507059e+37 }
 0x224   :  { %v268_v44 = vsel %vm267_vm12, %v996_v35, %v264_v42 }
 0x225   :  { %v273_v46 = vsel %vm270_vm13, %v272_v43, %v268_v44 }
 0x226   :  { %v296_v47 = vmul.f32 %v998_v45, %v273_v46  ;;  %v1002_v51 = vpop.eup %1001  ;;  %v295_v58 = vmul.f32 %v293_v54, %v273_v46 }
 0x227   :  { %v276_v52 = vmul.f32 %v1002_v51, %v259_v50  ;;  %vm281_vm14 = vweird.f32 %v1002_v51 }
 0x228   :  { %298 = vrot.lane.b32.xlu2 %v296_v47, %s1091_s1  ;;  %vm282_vm0 = vmor %vm280_vm15, %vm281_vm14 }
 0x229   :  { %v277_v55 = vsub.f32 1.0, %v276_v52 }
 0x22b   :  { %v278_v56 = vmul.f32 %v1002_v51, %v277_v55 }
 0x22d   :  { %v279_v63 = vadd.f32 %v1002_v51, %v278_v56 }
 0x22f   :  { %v283_v3 = vsel %vm282_vm0, %v1002_v51, %v279_v63 }
 0x230   :  { %v288_v9 = vsel %vm285_vm1, %v287_v6, %v283_v3  ;;  %v62_v6 = vpop.permute.xlu1 %61 }
 0x282   :  { %v299_v59 = vpop.permute.xlu2 %298 }
 0x283   :  { %v1285_v62 = vadd.f32 %v299_v59, %v295_v58 }
 0x285   :  { %1003 = vtanh.f32 %v1285_v62 }
 0x28b   :  { %v1004_v7 = vpop.eup %1003 }
 0x28c   :  { %v303_v10 = vmul.f32 %v1004_v7, %v288_v9  ;;  %v95_v7 = vmul.f32 %v1138_v4, %v62_v6 }
 0x28e   :  { %v304_v15 = vpack.c.bf16 %v303_v10, %v303_v10  ;;  %v116_v9 = vadd.f32 %v1140_v5, %v95_v7 }
 0x290   :  { %306 = vrot.lane.b32.xlu0 %v304_v15, %s1091_s1 }
 0x302   :  { %v307_v16 = vpop.permute.xlu0 %306 }
 0x303   :  { %936 = vmatmul.msk.bf16.vlgmr.msra.gmra.mxu2 %vm222_vm9, %v307_v16  ;;  %937 = vmatmul.msk.bf16.vlgmr.msra.gmra.mxu3 %vm222_vm9, %v307_v16 }
 0x304   :  { %639 = vmatpush.bf16.msra.mxu2 %v1162_v53  ;;  %652 = vmatpush.bf16.msra.mxu3 %v1173_v57 }
 0x308   :  { %640 = vmatpush.bf16.msra.mxu2 %v1182_v60  ;;  %653 = vmatpush.bf16.msra.mxu3 %v1186_v61 }
 0x30c   :  { %641 = vmatpush.bf16.msra.mxu2 %v1204_v2  ;;  %654 = vmatpush.bf16.msra.mxu3 %v1216_v8 }
 0x310   :  { %642 = vmatpush.bf16.msra.mxu2 %v1225_v12  ;;  %655 = vmatpush.bf16.msra.mxu3 %v1229_v14 }
 0x386   :  { %v320_v20 = vpop.f32.mrf.mxu2  ;;  %v333_v21 = vpop.f32.mrf.mxu3 }
 0x387   :  { %v321_v22 = vadd.f32 %v320_v20, %v114_v19  ;;  %v334_v31 = vadd.f32 %v333_v21, %v115_v29 }
 0x389   :  { %v938_v23 = vmul.f32 -1.442695, %v321_v22  ;;  %v939_v43 = vmul.f32 -1.442695, %v334_v31  ;;  %v96_v22 = vmul.f32 %v1144_v11, %v62_v6 }
 0x38b   :  { %1005 = vpow2.f32 %v938_v23  ;;  %v117_v23 = vadd.f32 %v1146_v13, %v96_v22 }
 0x38e   :  { %v322_v24 = vpop.f32.mrf.mxu2  ;;  %v335_v25 = vpop.f32.mrf.mxu3 }
 0x391   :  { %v1006_v26 = vpop.eup %1005 }
 0x392   :  { %v343_v27 = vadd.f32 1.0, %v1006_v26 }
 0x394   :  { %1007 = vrcp.f32 %v343_v27  ;;  %v356_v34 = vand.u32 2147483648, %v343_v27  ;;  %v354_v36 = vand.u32 2147483647, %v343_v27  ;;  %vm350_vm3 = vweird.f32 %v343_v27 }
 0x395   :  { %1009 = vtanh.f32 %v334_v31 }
 0x396   :  { %v357_v38 = vor.u32 1.1754944e-38, %v356_v34  ;;  %vm355_vm5 = vcmp.eq.f32.partialorder %v354_v36, 8.507059e+37  ;;  %1011 = vpow2.f32 %v939_v43 }
 0x39a   :  { %v1008_v30 = vpop.eup %1007 }
 0x39b   :  { %v346_v32 = vmul.f32 %v1008_v30, %v343_v27  ;;  %vm351_vm2 = vweird.f32 %v1008_v30  ;;  %v1010_v40 = vpop.eup %1009 }
 0x39c   :  { %vm352_vm4 = vmor %vm350_vm3, %vm351_vm2  ;;  %v1012_v44 = vpop.eup %1011 }
 0x39d   :  { %v347_v33 = vsub.f32 1.0, %v346_v32  ;;  %v344_v45 = vadd.f32 1.0, %v1012_v44 }
 0x39f   :  { %v348_v35 = vmul.f32 %v1008_v30, %v347_v33  ;;  %1013 = vrcp.f32 %v344_v45  ;;  %v371_v55 = vand.u32 2147483648, %v344_v45  ;;  %vm365_vm7 = vweird.f32 %v344_v45 }
 0x3a0   :  { %v369_v56 = vand.u32 2147483647, %v344_v45 }
 0x3a1   :  { %v349_v37 = vadd.f32 %v1008_v30, %v348_v35  ;;  %v372_v59 = vor.u32 1.1754944e-38, %v371_v55 }
 0x3a2   :  { %vm370_vm10 = vcmp.eq.f32.partialorder %v369_v56, 8.507059e+37 }
 0x3a3   :  { %v353_v39 = vsel %vm352_vm4, %v1008_v30, %v349_v37 }
 0x3a4   :  { %v358_v41 = vsel %vm355_vm5, %v357_v38, %v353_v39 }
 0x3a5   :  { %v377_v42 = vmul.f32 %v1010_v40, %v358_v41  ;;  %v1014_v46 = vpop.eup %1013  ;;  %v376_v50 = vmul.f32 %v358_v41, %v1285_v62 }
 0x3a6   :  { %v361_v47 = vmul.f32 %v1014_v46, %v344_v45  ;;  %vm366_vm6 = vweird.f32 %v1014_v46 }
 0x3a7   :  { %379 = vrot.lane.b32.xlu2 %v377_v42, %s1091_s1  ;;  %vm367_vm8 = vmor %vm365_vm7, %vm366_vm6 }
 0x3a8   :  { %v362_v48 = vsub.f32 1.0, %v361_v47 }
 0x3aa   :  { %v363_v49 = vmul.f32 %v1014_v46, %v362_v48 }
 0x3ac   :  { %v364_v54 = vadd.f32 %v1014_v46, %v363_v49 }
 0x3ae   :  { %v368_v58 = vsel %vm367_vm8, %v1014_v46, %v364_v54 }
 0x3af   :  { %v373_v0 = vsel %vm370_vm10, %v372_v59, %v368_v58  ;;  %v67_v59 = vpop.permute.xlu1 %66 }
 0x401   :  { %v380_v51 = vpop.permute.xlu2 %379 }
 0x402   :  { %v1305_v52 = vadd.f32 %v380_v51, %v376_v50 }
 0x404   :  { %1015 = vtanh.f32 %v1305_v52 }
 0x40a   :  { %v1016_v63 = vpop.eup %1015 }
 0x40b   :  { %v384_v1 = vmul.f32 %v1016_v63, %v373_v0  ;;  %v97_v63 = vmul.f32 %v1138_v4, %v67_v59 }
 0x40d   :  { %v385_v3 = vpack.c.bf16 %v384_v1, %v384_v1  ;;  %v118_v0 = vadd.f32 %v1140_v5, %v97_v63 }
 0x40f   :  { %387 = vrot.lane.b32.xlu0 %v385_v3, %s1091_s1 }
 0x481   :  { %v388_v62 = vpop.permute.xlu0 %387 }
 0x482   :  { %940 = vmatmul.msk.bf16.vlgmr.msrb.gmra.mxu0 %vm222_vm9, %v388_v62  ;;  %941 = vmatmul.msk.bf16.vlgmr.msrb.gmra.mxu1 %vm222_vm9, %v388_v62 }
 0x483   :  { %720 = vmatpush.bf16.msrb.mxu0 %v1162_v53  ;;  %733 = vmatpush.bf16.msrb.mxu1 %v1173_v57 }
 0x487   :  { %721 = vmatpush.bf16.msrb.mxu0 %v1182_v60  ;;  %734 = vmatpush.bf16.msrb.mxu1 %v1186_v61 }
 0x48b   :  { %722 = vmatpush.bf16.msrb.mxu0 %v1204_v2  ;;  %735 = vmatpush.bf16.msrb.mxu1 %v1216_v8 }
 0x48f   :  { %723 = vmatpush.bf16.msrb.mxu0 %v1225_v12  ;;  %736 = vmatpush.bf16.msrb.mxu1 %v1229_v14 }
 0x4ff   :  { %v401_v10 = vpop.f32.mrf.mxu0  ;;  %v414_v15 = vpop.f32.mrf.mxu1 }
 0x500   :  { %v402_v16 = vadd.f32 %v401_v10, %v116_v9  ;;  %v415_v25 = vadd.f32 %v414_v15, %v117_v23 }
 0x502   :  { %v942_v17 = vmul.f32 -1.442695, %v402_v16  ;;  %v943_v37 = vmul.f32 -1.442695, %v415_v25 }
 0x504   :  { %1017 = vpow2.f32 %v942_v17 }
 0x507   :  { %v403_v18 = vpop.f32.mrf.mxu0  ;;  %v416_v19 = vpop.f32.mrf.mxu1 }
 0x50a   :  { %v1018_v20 = vpop.eup %1017 }
 0x50b   :  { %v424_v21 = vadd.f32 1.0, %v1018_v20 }
 0x50d   :  { %1019 = vrcp.f32 %v424_v21  ;;  %v437_v28 = vand.u32 2147483648, %v424_v21  ;;  %v435_v30 = vand.u32 2147483647, %v424_v21  ;;  %vm431_vm12 = vweird.f32 %v424_v21 }
 0x50e   :  { %1021 = vtanh.f32 %v415_v25 }
 0x50f   :  { %v438_v32 = vor.u32 1.1754944e-38, %v437_v28  ;;  %vm436_vm14 = vcmp.eq.f32.partialorder %v435_v30, 8.507059e+37  ;;  %1023 = vpow2.f32 %v943_v37 }
 0x513   :  { %v1020_v24 = vpop.eup %1019 }
 0x514   :  { %v427_v26 = vmul.f32 %v1020_v24, %v424_v21  ;;  %vm432_vm11 = vweird.f32 %v1020_v24  ;;  %v1022_v34 = vpop.eup %1021 }
 0x515   :  { %vm433_vm13 = vmor %vm431_vm12, %vm432_vm11  ;;  %v1024_v38 = vpop.eup %1023 }
 0x516   :  { %v428_v27 = vsub.f32 1.0, %v427_v26  ;;  %v425_v39 = vadd.f32 1.0, %v1024_v38 }
 0x518   :  { %v429_v29 = vmul.f32 %v1020_v24, %v428_v27  ;;  %1025 = vrcp.f32 %v425_v39  ;;  %v452_v48 = vand.u32 2147483648, %v425_v39  ;;  %vm446_vm0 = vweird.f32 %v425_v39 }
 0x519   :  { %v450_v49 = vand.u32 2147483647, %v425_v39 }
 0x51a   :  { %v430_v31 = vadd.f32 %v1020_v24, %v429_v29  ;;  %v453_v51 = vor.u32 1.1754944e-38, %v452_v48 }
 0x51b   :  { %vm451_vm2 = vcmp.eq.f32.partialorder %v450_v49, 8.507059e+37 }
 0x51c   :  { %v434_v33 = vsel %vm433_vm13, %v1020_v24, %v430_v31 }
 0x51d   :  { %v439_v35 = vsel %vm436_vm14, %v438_v32, %v434_v33 }
 0x51e   :  { %v458_v36 = vmul.f32 %v1022_v34, %v439_v35  ;;  %v1026_v40 = vpop.eup %1025  ;;  %v457_v44 = vmul.f32 %v439_v35, %v1305_v52 }
 0x51f   :  { %v442_v41 = vmul.f32 %v1026_v40, %v425_v39  ;;  %vm447_vm15 = vweird.f32 %v1026_v40 }
 0x520   :  { %460 = vrot.lane.b32.xlu2 %v458_v36, %s1091_s1  ;;  %vm448_vm1 = vmor %vm446_vm0, %vm447_vm15 }
 0x521   :  { %v443_v42 = vsub.f32 1.0, %v442_v41 }
 0x523   :  { %v444_v43 = vmul.f32 %v1026_v40, %v443_v42 }
 0x525   :  { %v445_v47 = vadd.f32 %v1026_v40, %v444_v43  ;;  %v72_v43 = vpop.permute.xlu1 %71 }
 0x527   :  { %v449_v50 = vsel %vm448_vm1, %v1026_v40, %v445_v47 }
 0x528   :  { %v454_v55 = vsel %vm451_vm2, %v453_v51, %v449_v50 }
 0x57a   :  { %v461_v45 = vpop.permute.xlu2 %460 }
 0x57b   :  { %v1325_v46 = vadd.f32 %v461_v45, %v457_v44  ;;  %v99_v44 = vmul.f32 %v1138_v4, %v72_v43 }
 0x57d   :  { %1027 = vtanh.f32 %v1325_v46  ;;  %v120_v45 = vadd.f32 %v1140_v5, %v99_v44 }
 0x583   :  { %v1028_v54 = vpop.eup %1027 }
 0x584   :  { %v465_v56 = vmul.f32 %v1028_v54, %v454_v55 }
 0x586   :  { %v466_v58 = vpack.c.bf16 %v465_v56, %v465_v56  ;;  %v100_v56 = vmul.f32 %v1144_v11, %v72_v43 }
 0x588   :  { %468 = vrot.lane.b32.xlu0 %v466_v58, %s1091_s1  ;;  %v121_v58 = vadd.f32 %v1146_v13, %v100_v56 }
 0x5fa   :  { %v469_v52 = vpop.permute.xlu0 %468 }
 0x5fb   :  { %944 = vmatmul.msk.bf16.vlgmr.msrb.gmra.mxu2 %vm222_vm9, %v469_v52  ;;  %945 = vmatmul.msk.bf16.vlgmr.msrb.gmra.mxu3 %vm222_vm9, %v469_v52 }
 0x5fc   :  { %801 = vmatpush.bf16.msrb.mxu2 %v1162_v53  ;;  %814 = vmatpush.bf16.msrb.mxu3 %v1173_v57 }
 0x600   :  { %802 = vmatpush.bf16.msrb.mxu2 %v1182_v60  ;;  %815 = vmatpush.bf16.msrb.mxu3 %v1186_v61 }
 0x604   :  { %803 = vmatpush.bf16.msrb.mxu2 %v1204_v2  ;;  %816 = vmatpush.bf16.msrb.mxu3 %v1216_v8  ;;  %v98_v8 = vmul.f32 %v1144_v11, %v67_v59 }
 0x608   :  { %804 = vmatpush.bf16.msrb.mxu2 %v1225_v12  ;;  %817 = vmatpush.bf16.msrb.mxu3 %v1229_v14  ;;  %v119_v12 = vadd.f32 %v1146_v13, %v98_v8 }
 0x67e   :  { %v482_v53 = vpop.f32.mrf.mxu2  ;;  %v495_v1 = vpop.f32.mrf.mxu3 }
 0x67f   :  { %v483_v57 = vadd.f32 %v482_v53, %v118_v0  ;;  %v496_v6 = vadd.f32 %v495_v1, %v119_v12 }
 0x681   :  { %v946_v3 = vmul.f32 -1.442695, %v483_v57  ;;  %v947_v23 = vmul.f32 -1.442695, %v496_v6 }
 0x683   :  { %1029 = vpow2.f32 %v946_v3 }
 0x686   :  { %v484_v60 = vpop.f32.mrf.mxu2  ;;  %v497_v61 = vpop.f32.mrf.mxu3 }
 0x689   :  { %v1030_v62 = vpop.eup %1029 }
 0x68a   :  { %v505_v2 = vadd.f32 1.0, %v1030_v62 }
 0x68c   :  { %1031 = vrcp.f32 %v505_v2  ;;  %v518_v10 = vand.u32 2147483648, %v505_v2  ;;  %v516_v16 = vand.u32 2147483647, %v505_v2  ;;  %vm512_vm4 = vweird.f32 %v505_v2 }
 0x68d   :  { %1033 = vtanh.f32 %v496_v6 }
 0x68e   :  { %v519_v18 = vor.u32 1.1754944e-38, %v518_v10  ;;  %vm517_vm6 = vcmp.eq.f32.partialorder %v516_v16, 8.507059e+37  ;;  %1035 = vpow2.f32 %v947_v23 }
 0x692   :  { %v1032_v14 = vpop.eup %1031 }
 0x693   :  { %v508_v7 = vmul.f32 %v1032_v14, %v505_v2  ;;  %vm513_vm3 = vweird.f32 %v1032_v14  ;;  %v1034_v20 = vpop.eup %1033 }
 0x694   :  { %vm514_vm5 = vmor %vm512_vm4, %vm513_vm3  ;;  %v1036_v24 = vpop.eup %1035 }
 0x695   :  { %v509_v9 = vsub.f32 1.0, %v508_v7  ;;  %v506_v25 = vadd.f32 1.0, %v1036_v24 }
 0x697   :  { %v510_v15 = vmul.f32 %v1032_v14, %v509_v9  ;;  %1037 = vrcp.f32 %v506_v25  ;;  %v533_v34 = vand.u32 2147483648, %v506_v25  ;;  %vm527_vm8 = vweird.f32 %v506_v25 }
 0x698   :  { %v531_v35 = vand.u32 2147483647, %v506_v25 }
 0x699   :  { %v511_v17 = vadd.f32 %v1032_v14, %v510_v15  ;;  %v534_v37 = vor.u32 1.1754944e-38, %v533_v34 }
 0x69a   :  { %vm532_vm11 = vcmp.eq.f32.partialorder %v531_v35, 8.507059e+37 }
 0x69b   :  { %v515_v19 = vsel %vm514_vm5, %v1032_v14, %v511_v17 }
 0x69c   :  { %v520_v21 = vsel %vm517_vm6, %v519_v18, %v515_v19 }
 0x69d   :  { %v539_v22 = vmul.f32 %v1034_v20, %v520_v21  ;;  %v1038_v26 = vpop.eup %1037  ;;  %v538_v30 = vmul.f32 %v520_v21, %v1325_v46 }
 0x69e   :  { %v523_v27 = vmul.f32 %v1038_v26, %v506_v25  ;;  %vm528_vm7 = vweird.f32 %v1038_v26 }
 0x69f   :  { %541 = vrot.lane.b32.xlu2 %v539_v22, %s1091_s1  ;;  %vm529_vm10 = vmor %vm527_vm8, %vm528_vm7 }
 0x6a0   :  { %v524_v28 = vsub.f32 1.0, %v523_v27 }
 0x6a2   :  { %v525_v29 = vmul.f32 %v1038_v26, %v524_v28 }
 0x6a4   :  { %v526_v33 = vadd.f32 %v1038_v26, %v525_v29  ;;  %v77_v29 = vpop.permute.xlu1 %76 }
 0x6a6   :  { %v530_v36 = vsel %vm529_vm10, %v1038_v26, %v526_v33 }
 0x6a7   :  { %v535_v39 = vsel %vm532_vm11, %v534_v37, %v530_v36 }
 0x6f9   :  { %v542_v31 = vpop.permute.xlu2 %541 }
 0x6fa   :  { %v544_v32 = vadd.f32 %v542_v31, %v538_v30  ;;  %v101_v30 = vmul.f32 %v1138_v4, %v77_v29 }
 0x6fc   :  { %1039 = vtanh.f32 %v544_v32  ;;  %v122_v31 = vadd.f32 %v1140_v5, %v101_v30 }
 0x702   :  { %v1040_v38 = vpop.eup %1039 }
 0x703   :  { %v546_v40 = vmul.f32 %v1040_v38, %v535_v39 }
 0x705   :  { %v547_v41 = vpack.c.bf16 %v546_v40, %v546_v40  ;;  %v102_v40 = vmul.f32 %v1144_v11, %v77_v29 }
 0x707   :  { %549 = vrot.lane.b32.xlu0 %v547_v41, %s1091_s1  ;;  %v123_v41 = vadd.f32 %v1146_v13, %v102_v40 }
 0x779   :  { %v550_v42 = vpop.permute.xlu0 %549 }
 0x77a   :  { %948 = vmatmul.msk.bf16.vlgmr.msra.gmra.mxu0 %vm222_vm9, %v550_v42  ;;  %949 = vmatmul.msk.bf16.vlgmr.msra.gmra.mxu1 %vm222_vm9, %v550_v42 }
 0x7f7   :  { %v563_v46 = vpop.f32.mrf.mxu0  ;;  %v576_v47 = vpop.f32.mrf.mxu1 }
 0x7f8   :  { %v564_v48 = vadd.f32 %v563_v46, %v120_v45  ;;  %v577_v59 = vadd.f32 %v576_v47, %v121_v58 }
 0x7fa   :  { %v950_v49 = vmul.f32 -1.442695, %v564_v48  ;;  %v951_v12 = vmul.f32 -1.442695, %v577_v59 }
 0x7fc   :  { %1041 = vpow2.f32 %v950_v49 }
 0x7ff   :  { %v565_v50 = vpop.f32.mrf.mxu0  ;;  %v578_v51 = vpop.f32.mrf.mxu1 }
 0x802   :  { %v1042_v54 = vpop.eup %1041 }
 0x803   :  { %v586_v55 = vadd.f32 1.0, %v1042_v54 }
 0x805   :  { %1043 = vrcp.f32 %v586_v55  ;;  %v599_v53 = vand.u32 2147483648, %v586_v55  ;;  %v597_v57 = vand.u32 2147483647, %v586_v55  ;;  %vm593_vm13 = vweird.f32 %v586_v55 }
 0x806   :  { %1045 = vtanh.f32 %v577_v59 }
 0x807   :  { %v600_v60 = vor.u32 1.1754944e-38, %v599_v53  ;;  %vm598_vm15 = vcmp.eq.f32.partialorder %v597_v57, 8.507059e+37  ;;  %1047 = vpow2.f32 %v951_v12 }
 0x80b   :  { %v1044_v52 = vpop.eup %1043 }
 0x80c   :  { %v589_v63 = vmul.f32 %v1044_v52, %v586_v55  ;;  %vm594_vm12 = vweird.f32 %v1044_v52  ;;  %v1046_v62 = vpop.eup %1045 }
 0x80d   :  { %vm595_vm14 = vmor %vm593_vm13, %vm594_vm12  ;;  %v1048_v14 = vpop.eup %1047 }
 0x80e   :  { %v590_v0 = vsub.f32 1.0, %v589_v63  ;;  %v587_v6 = vadd.f32 1.0, %v1048_v14 }
 0x810   :  { %v591_v1 = vmul.f32 %v1044_v52, %v590_v0  ;;  %1049 = vrcp.f32 %v587_v6  ;;  %v614_v20 = vand.u32 2147483648, %v587_v6  ;;  %vm608_vm1 = vweird.f32 %v587_v6 }
 0x811   :  { %v612_v21 = vand.u32 2147483647, %v587_v6 }
 0x812   :  { %v592_v3 = vadd.f32 %v1044_v52, %v591_v1  ;;  %v615_v23 = vor.u32 1.1754944e-38, %v614_v20 }
 0x813   :  { %vm613_vm3 = vcmp.eq.f32.partialorder %v612_v21, 8.507059e+37 }
 0x814   :  { %v596_v61 = vsel %vm595_vm14, %v1044_v52, %v592_v3 }
 0x815   :  { %v601_v2 = vsel %vm598_vm15, %v600_v60, %v596_v61 }
 0x816   :  { %v620_v8 = vmul.f32 %v1046_v62, %v601_v2  ;;  %v1050_v7 = vpop.eup %1049  ;;  %v619_v16 = vmul.f32 %v601_v2, %v544_v32 }
 0x817   :  { %v604_v9 = vmul.f32 %v1050_v7, %v587_v6  ;;  %vm609_vm0 = vweird.f32 %v1050_v7 }
 0x818   :  { %622 = vrot.lane.b32.xlu2 %v620_v8, %s1091_s1  ;;  %vm610_vm2 = vmor %vm608_vm1, %vm609_vm0 }
 0x819   :  { %v605_v10 = vsub.f32 1.0, %v604_v9 }
 0x81b   :  { %v606_v15 = vmul.f32 %v1050_v7, %v605_v10 }
 0x81d   :  { %v607_v19 = vadd.f32 %v1050_v7, %v606_v15  ;;  %v82_v15 = vpop.permute.xlu1 %81 }
 0x81f   :  { %v611_v22 = vsel %vm610_vm2, %v1050_v7, %v607_v19 }
 0x820   :  { %v616_v25 = vsel %vm613_vm3, %v615_v23, %v611_v22 }
 0x872   :  { %v623_v17 = vpop.permute.xlu2 %622 }
 0x873   :  { %v625_v18 = vadd.f32 %v623_v17, %v619_v16  ;;  %v103_v16 = vmul.f32 %v1138_v4, %v82_v15 }
 0x875   :  { %1051 = vtanh.f32 %v625_v18  ;;  %v124_v17 = vadd.f32 %v1140_v5, %v103_v16 }
 0x87b   :  { %v1052_v24 = vpop.eup %1051 }
 0x87c   :  { %v627_v26 = vmul.f32 %v1052_v24, %v616_v25 }
 0x87e   :  { %v628_v27 = vpack.c.bf16 %v627_v26, %v627_v26  ;;  %v104_v26 = vmul.f32 %v1144_v11, %v82_v15 }
 0x880   :  { %630 = vrot.lane.b32.xlu0 %v628_v27, %s1091_s1  ;;  %v125_v27 = vadd.f32 %v1146_v13, %v104_v26 }
 0x8f2   :  { %v631_v28 = vpop.permute.xlu0 %630 }
 0x8f3   :  { %952 = vmatmul.msk.bf16.vlgmr.msra.gmra.mxu2 %vm222_vm9, %v631_v28  ;;  %953 = vmatmul.msk.bf16.vlgmr.msra.gmra.mxu3 %vm222_vm9, %v631_v28 }
 0x976   :  { %v644_v32 = vpop.f32.mrf.mxu2  ;;  %v657_v33 = vpop.f32.mrf.mxu3 }
 0x977   :  { %v645_v34 = vadd.f32 %v644_v32, %v122_v31  ;;  %v658_v43 = vadd.f32 %v657_v33, %v123_v41 }
 0x979   :  { %v954_v35 = vmul.f32 -1.442695, %v645_v34  ;;  %v955_v58 = vmul.f32 -1.442695, %v658_v43 }
 0x97b   :  { %1053 = vpow2.f32 %v954_v35 }
 0x97e   :  { %v646_v36 = vpop.f32.mrf.mxu2  ;;  %v659_v37 = vpop.f32.mrf.mxu3 }
 0x981   :  { %v1054_v38 = vpop.eup %1053 }
 0x982   :  { %v667_v39 = vadd.f32 1.0, %v1054_v38 }
 0x984   :  { %1055 = vrcp.f32 %v667_v39  ;;  %v680_v46 = vand.u32 2147483648, %v667_v39  ;;  %v678_v48 = vand.u32 2147483647, %v667_v39  ;;  %vm674_vm5 = vweird.f32 %v667_v39 }
 0x985   :  { %1057 = vtanh.f32 %v658_v43 }
 0x986   :  { %v681_v50 = vor.u32 1.1754944e-38, %v680_v46  ;;  %vm679_vm7 = vcmp.eq.f32.partialorder %v678_v48, 8.507059e+37  ;;  %1059 = vpow2.f32 %v955_v58 }
 0x98a   :  { %v1056_v42 = vpop.eup %1055 }
 0x98b   :  { %v670_v44 = vmul.f32 %v1056_v42, %v667_v39  ;;  %vm675_vm4 = vweird.f32 %v1056_v42  ;;  %v1058_v54 = vpop.eup %1057 }
 0x98c   :  { %vm676_vm6 = vmor %vm674_vm5, %vm675_vm4  ;;  %v1060_v52 = vpop.eup %1059 }
 0x98d   :  { %v671_v45 = vsub.f32 1.0, %v670_v44  ;;  %v668_v59 = vadd.f32 1.0, %v1060_v52 }
 0x98f   :  { %v672_v47 = vmul.f32 %v1056_v42, %v671_v45  ;;  %1061 = vrcp.f32 %v668_v59  ;;  %v695_v62 = vand.u32 2147483648, %v668_v59  ;;  %vm689_vm10 = vweird.f32 %v668_v59 }
 0x990   :  { %v693_v2 = vand.u32 2147483647, %v668_v59 }
 0x991   :  { %v673_v49 = vadd.f32 %v1056_v42, %v672_v47  ;;  %v696_v12 = vor.u32 1.1754944e-38, %v695_v62 }
 0x992   :  { %vm694_vm12 = vcmp.eq.f32.partialorder %v693_v2, 8.507059e+37 }
 0x993   :  { %v677_v51 = vsel %vm676_vm6, %v1056_v42, %v673_v49 }
 0x994   :  { %v682_v55 = vsel %vm679_vm7, %v681_v50, %v677_v51 }
 0x995   :  { %v701_v56 = vmul.f32 %v1058_v54, %v682_v55  ;;  %v1062_v63 = vpop.eup %1061  ;;  %v700_v57 = vmul.f32 %v682_v55, %v625_v18 }
 0x996   :  { %v685_v0 = vmul.f32 %v1062_v63, %v668_v59  ;;  %vm690_vm8 = vweird.f32 %v1062_v63 }
 0x997   :  { %703 = vrot.lane.b32.xlu2 %v701_v56, %s1091_s1  ;;  %vm691_vm11 = vmor %vm689_vm10, %vm690_vm8 }
 0x998   :  { %v686_v53 = vsub.f32 1.0, %v685_v0 }
 0x99a   :  { %v687_v1 = vmul.f32 %v1062_v63, %v686_v53 }
 0x99c   :  { %v688_v61 = vadd.f32 %v1062_v63, %v687_v1 }
 0x99e   :  { %v692_v8 = vsel %vm691_vm11, %v1062_v63, %v688_v61 }
 0x99f   :  { %v697_v6 = vsel %vm694_vm12, %v696_v12, %v692_v8 }
 0x9f1   :  { %v704_v3 = vpop.permute.xlu2 %703 }
 0x9f2   :  { %v706_v60 = vadd.f32 %v704_v3, %v700_v57  ;;  %v979_v57 = vld [vmem:[%s1388_s4] ss:$0 sm:$0xff]  ;;  %s1093_s4 = smov 32  }
 0x9f4   :  { %1063 = vtanh.f32 %v706_v60 }
 0x9fa   :  { %v1064_v14 = vpop.eup %1063 }
 0x9fb   :  { %v708_v7 = vmul.f32 %v1064_v14, %v697_v6 }
 0x9fd   :  { %v709_v9 = vpack.c.bf16 %v708_v7, %v708_v7 }
 0x9ff   :  { %711 = vrot.lane.b32.xlu0 %v709_v9, %s1091_s1 }
 0xa71   :  { %v712_v10 = vpop.permute.xlu0 %711 }
 0xa72   :  { %956 = vmatmul.msk.bf16.vlgmr.msrb.gmra.mxu0 %vm222_vm9, %v712_v10  ;;  %957 = vmatmul.msk.bf16.vlgmr.msrb.gmra.mxu1 %vm222_vm9, %v712_v10 }
 0xaef   :  { %v725_v18 = vpop.f32.mrf.mxu0  ;;  %v738_v19 = vpop.f32.mrf.mxu1 }
 0xaf0   :  { %v726_v20 = vadd.f32 %v725_v18, %v124_v17  ;;  %v739_v29 = vadd.f32 %v738_v19, %v125_v27 }
 0xaf2   :  { %v958_v21 = vmul.f32 -1.442695, %v726_v20  ;;  %v959_v39 = vmul.f32 -1.442695, %v739_v29 }
 0xaf4   :  { %1065 = vpow2.f32 %v958_v21 }
 0xaf7   :  { %v727_v22 = vpop.f32.mrf.mxu0  ;;  %v740_v23 = vpop.f32.mrf.mxu1 }
 0xafa   :  { %v1066_v24 = vpop.eup %1065 }
 0xafb   :  { %v748_v25 = vadd.f32 1.0, %v1066_v24 }
 0xafd   :  { %1067 = vrcp.f32 %v748_v25  ;;  %v761_v31 = vand.u32 2147483648, %v748_v25  ;;  %v759_v33 = vand.u32 2147483647, %v748_v25  ;;  %vm755_vm14 = vweird.f32 %v748_v25 }
 0xafe   :  { %1069 = vtanh.f32 %v739_v29 }
 0xaff   :  { %v762_v35 = vor.u32 1.1754944e-38, %v761_v31  ;;  %vm760_vm0 = vcmp.eq.f32.partialorder %v759_v33, 8.507059e+37  ;;  %1071 = vpow2.f32 %v959_v39 }
 0xb03   :  { %v1068_v28 = vpop.eup %1067 }
 0xb04   :  { %v751_v30 = vmul.f32 %v1068_v28, %v748_v25  ;;  %vm756_vm13 = vweird.f32 %v1068_v28  ;;  %v1070_v37 = vpop.eup %1069 }
 0xb05   :  { %vm757_vm15 = vmor %vm755_vm14, %vm756_vm13  ;;  %v1072_v40 = vpop.eup %1071  ;;  %vm882_vm13 = vcmask 261120   ;;  %vm891_vm14 = vcmask 7168  }
 0xb06   :  { %v752_v4 = vsub.f32 1.0, %v751_v30  ;;  %v749_v41 = vadd.f32 1.0, %v1072_v40 }
 0xb08   :  { %v753_v32 = vmul.f32 %v1068_v28, %v752_v4  ;;  %1073 = vrcp.f32 %v749_v41  ;;  %v776_v50 = vand.u32 2147483648, %v749_v41  ;;  %vm770_vm2 = vweird.f32 %v749_v41 }
 0xb09   :  { %v774_v51 = vand.u32 2147483647, %v749_v41 }
 0xb0a   :  { %v754_v34 = vadd.f32 %v1068_v28, %v753_v32  ;;  %v777_v55 = vor.u32 1.1754944e-38, %v776_v50 }
 0xb0b   :  { %vm775_vm4 = vcmp.eq.f32.partialorder %v774_v51, 8.507059e+37 }
 0xb0c   :  { %v758_v36 = vsel %vm757_vm15, %v1068_v28, %v754_v34 }
 0xb0d   :  { %v763_v11 = vsel %vm760_vm0, %v762_v35, %v758_v36 }
 0xb0e   :  { %v782_v38 = vmul.f32 %v1070_v37, %v763_v11  ;;  %v1074_v42 = vpop.eup %1073  ;;  %v781_v46 = vmul.f32 %v763_v11, %v706_v60  ;;  %v11_v11 = vstv %s1389_s5 }
 0xb0f   :  { %v766_v43 = vmul.f32 %v1074_v42, %v749_v41  ;;  %vm771_vm1 = vweird.f32 %v1074_v42  ;;  %12 = vst [vmem:[#allocation2] sm:$0x1] %v11_v11 }
 0xb10   :  { %784 = vrot.lane.b32.xlu2 %v782_v38, %s1091_s1  ;;  %vm772_vm3 = vmor %vm770_vm2, %vm771_vm1 }
 0xb11   :  { %v767_v44 = vsub.f32 1.0, %v766_v43 }
 0xb13   :  { %v768_v45 = vmul.f32 %v1074_v42, %v767_v44 }
 0xb15   :  { %v769_v49 = vadd.f32 %v1074_v42, %v768_v45 }
 0xb16   :  { %v980_v40 = vld [vmem:[#allocation2] ss:$0 sm:$0xff] }
 0xb17   :  { %v773_v54 = vsel %vm772_vm3, %v1074_v42, %v769_v49 }
 0xb18   :  { %v778_v58 = vsel %vm775_vm4, %v777_v55, %v773_v54  ;;  %874 = vrot.lane.b32.xlu2 %v979_v57, %s1092_s23 }
 0xb6a   :  { %v785_v47 = vpop.permute.xlu2 %784 }
 0xb6b   :  { %v787_v48 = vadd.f32 %v785_v47, %v781_v46 }
 0xb6d   :  { %1075 = vtanh.f32 %v787_v48 }
 0xb72   :  { %v875_v34 = vpop.permute.xlu2 %874 }
 0xb73   :  { %v1076_v56 = vpop.eup %1075 }
 0xb74   :  { %v789_v52 = vmul.f32 %v1076_v56, %v778_v58 }
 0xb76   :  { %v790_v59 = vpack.c.bf16 %v789_v52, %v789_v52 }
 0xb78   :  { %792 = vrot.lane.b32.xlu0 %v790_v59, %s1091_s1 }
 0xbea   :  { %v793_v63 = vpop.permute.xlu0 %792 }
 0xbeb   :  { %960 = vmatmul.msk.bf16.vlgmr.msrb.gmra.mxu2 %vm222_vm9, %v793_v63  ;;  %961 = vmatmul.msk.bf16.vlgmr.msrb.gmra.mxu3 %vm222_vm9, %v793_v63 }
 0xc6e   :  { %v806_v0 = vpop.f32.mrf.mxu2  ;;  %v819_v53 = vpop.f32.mrf.mxu3 }
 0xc6f   :  { %v807_v1 = vadd.f32 %v806_v0, %v1140_v5  ;;  %v820_v12 = vadd.f32 %v819_v53, %v1146_v13 }
 0xc71   :  { %v962_v3 = vmul.f32 -1.442695, %v807_v1  ;;  %v963_v20 = vmul.f32 -1.442695, %v820_v12 }
 0xc73   :  { %1077 = vpow2.f32 %v962_v3 }
 0xc76   :  { %v808_v60 = vpop.f32.mrf.mxu2  ;;  %v821_v61 = vpop.f32.mrf.mxu3 }
 0xc79   :  { %v1078_v62 = vpop.eup %1077 }
 0xc7a   :  { %v829_v2 = vadd.f32 1.0, %v1078_v62 }
 0xc7c   :  { %1079 = vrcp.f32 %v829_v2  ;;  %v842_v5 = vand.u32 2147483648, %v829_v2  ;;  %v840_v9 = vand.u32 2147483647, %v829_v2  ;;  %vm836_vm5 = vweird.f32 %v829_v2 }
 0xc7d   :  { %1081 = vtanh.f32 %v820_v12 }
 0xc7e   :  { %v843_v15 = vor.u32 1.1754944e-38, %v842_v5  ;;  %vm841_vm7 = vcmp.eq.f32.partialorder %v840_v9, 8.507059e+37  ;;  %1083 = vpow2.f32 %v963_v20 }
 0xc82   :  { %v1080_v8 = vpop.eup %1079 }
 0xc83   :  { %v832_v14 = vmul.f32 %v1080_v8, %v829_v2  ;;  %vm837_vm9 = vweird.f32 %v1080_v8  ;;  %v1082_v17 = vpop.eup %1081 }
 0xc84   :  { %vm838_vm6 = vmor %vm836_vm5, %vm837_vm9  ;;  %v1084_v13 = vpop.eup %1083 }
 0xc85   :  { %v833_v6 = vsub.f32 1.0, %v832_v14  ;;  %v830_v21 = vadd.f32 1.0, %v1084_v13 }
 0xc87   :  { %v834_v7 = vmul.f32 %v1080_v8, %v833_v6  ;;  %1085 = vrcp.f32 %v830_v21  ;;  %v857_v30 = vand.u32 2147483648, %v830_v21  ;;  %vm851_vm10 = vweird.f32 %v830_v21 }
 0xc88   :  { %v855_v4 = vand.u32 2147483647, %v830_v21 }
 0xc89   :  { %v835_v10 = vadd.f32 %v1080_v8, %v834_v7  ;;  %v858_v32 = vor.u32 1.1754944e-38, %v857_v30 }
 0xc8a   :  { %vm856_vm12 = vcmp.eq.f32.partialorder %v855_v4, 8.507059e+37 }
 0xc8b   :  { %v839_v16 = vsel %vm838_vm6, %v1080_v8, %v835_v10 }
 0xc8c   :  { %v844_v18 = vsel %vm841_vm7, %v843_v15, %v839_v16 }
 0xc8d   :  { %v863_v19 = vmul.f32 %v1082_v17, %v844_v18  ;;  %v1086_v22 = vpop.eup %1085  ;;  %v862_v26 = vmul.f32 %v844_v18, %v787_v48 }
 0xc8e   :  { %v847_v23 = vmul.f32 %v1086_v22, %v830_v21  ;;  %vm852_vm8 = vweird.f32 %v1086_v22 }
 0xc8f   :  { %865 = vrot.lane.b32.xlu1 %v863_v19, %s1091_s1  ;;  %vm853_vm11 = vmor %vm851_vm10, %vm852_vm8 }
 0xc90   :  { %v848_v24 = vsub.f32 1.0, %v847_v23 }
 0xc92   :  { %v849_v25 = vmul.f32 %v1086_v22, %v848_v24 }
 0xc94   :  { %v850_v29 = vadd.f32 %v1086_v22, %v849_v25 }
 0xc96   :  { %v854_v31 = vsel %vm853_vm11, %v1086_v22, %v850_v29 }
 0xc97   :  { %v859_v35 = vsel %vm856_vm12, %v858_v32, %v854_v31 }
 0xd01   :  { %v866_v27 = vpop.permute.xlu1 %865 }
 0xd02   :  { %v868_v28 = vadd.f32 %v866_v27, %v862_v26 }
 0xd04   :  { %1087 = vtanh.f32 %v868_v28 }
 0xd0a   :  { %v1088_v33 = vpop.eup %1087 }
 0xd0b   :  { %v870_v36 = vmul.f32 %v1088_v33, %v859_v35 }
 0xd0d   :  { %v877_v37 = vmul.f32 %v875_v34, %v870_v36 }
 0xd0f   :  { %879 = vrot.lane.b32.xlu0 %v877_v37, %s1093_s4 }
 0xd81   :  { %v880_v38 = vpop.permute.xlu0 %879 }
 0xd82   :  { %v883_v39 = vsel %vm882_vm13, %v880_v38, 0.0 }
 0xd83   :  { %884 = vadd.xlane.f32.xlu1 %v883_v39 }
 0xdf6   :  { %v885_v41 = vpop.xlane.xlu1 %884 }
 0xdf7   :  { %v890_v42 = vadd.f32 %v980_v40, %v885_v41 }
 0xdf9   :  { %892 = vst.msk [vmem:[%s1390_s6] sm:$0xff] %vm891_vm14, %v890_v42 }

</bundles_post_ra>
